<compile_context>
chip_gen: v5e
topology: v5e:2x2
jax: 0.10.0
libtpu: 0.0.40
codegen_flags: <defaults>
</compile_context>

<pallas_src>
import jax
import jax.numpy as jnp
from jax.experimental import pallas as pl
from jax.experimental.pallas import tpu as pltpu

LOG_STD_MAX = 2.0
LOG_STD_MIN = -5.0
LOG_STD_SCALE = 0.5 * (LOG_STD_MAX - LOG_STD_MIN)          # 3.5
LOG_STD_SHIFT = LOG_STD_MIN + LOG_STD_SCALE                # -1.5

HID1 = 256
HID2 = 128


def policy_kernel(x_ref, w1_ref, b1_ref, w2_ref, b2_ref, wh_ref, bh_ref,
                  mask_ref, out_ref):
    """One batch tile: fc1+relu, fc2+relu, fused lane-dense [mean|log_std] head."""
    # fc1 + relu (MXU in compute dtype, f32 accumulate; bias/relu in f32).
    h1 = jnp.dot(x_ref[...], w1_ref[...], preferred_element_type=jnp.float32)
    h1 = jnp.maximum(h1 + b1_ref[...], 0.0)
    # fc2 + relu.
    h2 = jnp.dot(h1.astype(w2_ref.dtype), w2_ref[...],
                 preferred_element_type=jnp.float32)
    h2 = jnp.maximum(h2 + b2_ref[...], 0.0)
    # Fused heads: one matmul producing [mean | logstd_pre | 0-pad] over a
    # lane-dense (multiple-of-128) slab.
    head = jnp.dot(h2.astype(wh_ref.dtype), wh_ref[...],
                   preferred_element_type=jnp.float32) + bh_ref[...]
    # tanh + affine over the whole slab (EUP slot, effectively free under the
    # MXU work), then per-column select with the precomputed resident mask
    # (1.0 for mean columns) -- no iota/compare, no narrow slices/concat.
    squashed = jnp.tanh(head) * LOG_STD_SCALE + LOG_STD_SHIFT
    out_ref[...] = jnp.where(mask_ref[...] > 0.0, head, squashed).astype(out_ref.dtype)


def prepare_policy_params(params, compute_dtype=jnp.float32):
    """One-time packing of the PyTorch-style params for the kernel.

    Hoists out of the per-call path: the [mean|logstd] head fusion, zero-pad
    of the head to a lane-dense width, all compute-dtype casts (bf16 halves
    weight DMA and feeds the bf16 MXU on v6e/v7x), and the column mask.
    """
    w1, b1, w2, b2, wm, bm, wl, bl = params
    out_dim = int(wm.shape[1])
    head_dim = 2 * out_dim
    head_pad = max(128, ((head_dim + 127) // 128) * 128)

    wh = jnp.concatenate([wm, wl], axis=1)
    bh = jnp.concatenate([bm, bl], axis=1)
    if head_pad != head_dim:
        wh = jnp.pad(wh, ((0, 0), (0, head_pad - head_dim)))
        bh = jnp.pad(bh, ((0, 0), (0, head_pad - head_dim)))
    mean_mask = (jnp.arange(head_pad) < out_dim).astype(jnp.float32)[None, :]

    return {
        "w1": jnp.asarray(w1, compute_dtype),
        "b1": jnp.asarray(b1, jnp.float32),
        "w2": jnp.asarray(w2, compute_dtype),
        "b2": jnp.asarray(b2, jnp.float32),
        "wh": jnp.asarray(wh, compute_dtype),
        "bh": jnp.asarray(bh, jnp.float32),
        "mean_mask": mean_mask,
        "out_dim": out_dim,
        "head_pad": head_pad,
        "compute_dtype": jnp.dtype(compute_dtype),
    }


def policy_forward(x, prepared, *, tile_rows=2048):
    """x: [B, input_shape].  Returns (mean, log_std): [B, output_shape] float32."""
    w1, b1 = prepared["w1"], prepared["b1"]
    w2, b2 = prepared["w2"], prepared["b2"]
    wh, bh = prepared["wh"], prepared["bh"]
    mask = prepared["mean_mask"]
    out_dim = prepared["out_dim"]
    head_pad = prepared["head_pad"]
    compute_dtype = prepared["compute_dtype"]

    B, in_dim = x.shape
    hid1 = int(w1.shape[1])
    hid2 = int(w2.shape[1])
    cbytes = jnp.dtype(compute_dtype).itemsize

    xc = x.astype(compute_dtype)

    # Batch tiling: large tiles amortize the ~0.35 us/grid-step pipeline
    # overhead that dominates this small per-row workload.  The row tile must
    # respect the sublane packing of the compute dtype (8 rows f32, 16 rows
    # bf16) unless it equals the full padded batch.
    row_align = 16 if cbytes < 4 else 8
    b_aligned = ((B + row_align - 1) // row_align) * row_align
    tb = min(tile_rows, b_aligned)
    tb = ((tb + row_align - 1) // row_align) * row_align
    b_pad = ((b_aligned + tb - 1) // tb) * tb
    if b_pad != B:
        xc = jnp.pad(xc, ((0, b_pad - B), (0, 0)))
    grid = (b_pad // tb,)

    # Explicit VMEM budget (f32 h1/h2/head temporaries dominate at large tb);
    # keeps v5e above its 16 MiB default scoped limit while staying well under
    # v7x's 64 MiB physical VMEM.
    vmem_est = (
        2 * tb * in_dim * cbytes                                       # x (2-buf)
        + 2 * tb * head_pad * 4                                        # out (2-buf)
        + tb * (hid1 + hid2 + head_pad) * 4                            # h1/h2/head temps
        + 2 * (in_dim * hid1 + hid1 * hid2 + hid2 * head_pad) * cbytes # weights
        + 2 * (hid1 + hid2 + 2 * head_pad) * 4                         # biases + mask
    )
    vmem_limit = min(max(int(vmem_est * 1.5) + (2 << 20), 32 << 20), 48 << 20)

    cost = pl.CostEstimate(
        flops=2 * b_pad * (in_dim * hid1 + hid1 * hid2 + hid2 * head_pad),
        transcendentals=b_pad * head_pad,
        bytes_accessed=(b_pad * in_dim * cbytes + b_pad * head_pad * 4
                        + (in_dim * hid1 + hid1 * hid2 + hid2 * head_pad) * cbytes
                        + (hid1 + hid2 + 2 * head_pad) * 4),
    )

    resident = lambda shape: pl.BlockSpec(shape, lambda i: (0, 0))
    # NOTE: resident weights could be single-buffered (pl.Buffered(1)) for a
    # ~150 KB VMEM saving; skipped as negligible next to the activation temps.

    fused_out = pl.pallas_call(
        policy_kernel,
        out_shape=jax.ShapeDtypeStruct((b_pad, head_pad), jnp.float32),
        grid=grid,
        in_specs=[
            pl.BlockSpec((tb, in_dim), lambda i: (i, 0)),   # x (batch-tiled)
            resident((in_dim, hid1)),                       # w1 (VMEM resident)
            resident((1, hid1)),                            # b1
            resident((hid1, hid2)),                         # w2
            resident((1, hid2)),                            # b2
            resident((hid2, head_pad)),                     # wh = [wm | wl | 0]
            resident((1, head_pad)),                        # bh = [bm | bl | 0]
            resident((1, head_pad)),                        # mean-column mask
        ],
        out_specs=pl.BlockSpec((tb, head_pad), lambda i: (i, 0)),
        compiler_params=pltpu.CompilerParams(
            dimension_semantics=("parallel",),
            vmem_limit_bytes=vmem_limit),
        cost_estimate=cost,
    )(xc, w1, b1, w2, b2, wh, bh, mask)

    mean = fused_out[:B, :out_dim]
    log_std = fused_out[:B, out_dim:2 * out_dim]
    return mean, log_std


def _xavier_uniform(key, fan_in, fan_out):
    # matches torch.nn.init.xavier_uniform_ (gain=1)
    limit = (6.0 / (fan_in + fan_out)) ** 0.5
    return jax.random.uniform(key, (fan_in, fan_out), jnp.float32, -limit, limit)


def init_policy_params(key, input_shape, output_shape):
    k1, k2, k3, k4 = jax.random.split(key, 4)
    w1 = _xavier_uniform(k1, input_shape, HID1)
    b1 = jnp.zeros((1, HID1), jnp.float32)
    w2 = _xavier_uniform(k2, HID1, HID2)
    b2 = jnp.zeros((1, HID2), jnp.float32)
    wm = _xavier_uniform(k3, HID2, output_shape)
    bm = jnp.zeros((1, output_shape), jnp.float32)
    wl = _xavier_uniform(k4, HID2, output_shape)
    bl = jnp.zeros((1, output_shape), jnp.float32)
    return (w1, b1, w2, b2, wm, bm, wl, bl)


def reference_forward(x, params):
    w1, b1, w2, b2, wm, bm, wl, bl = params
    h1 = jnp.maximum(x @ w1 + b1, 0.0)
    h2 = jnp.maximum(h1 @ w2 + b2, 0.0)
    mean = h2 @ wm + bm
    ls = jnp.tanh(h2 @ wl + bl)
    ls = LOG_STD_MIN + 0.5 * (LOG_STD_MAX - LOG_STD_MIN) * (ls + 1.0)
    return mean, ls


if __name__ == "__main__":
    key = jax.random.PRNGKey(0)
    k_param, k_x1, k_x2 = jax.random.split(key, 3)

    input_shape = 16   # env.observation_space.shape[0]
    output_shape = 4   # env.action_space.shape[0]
    params = init_policy_params(k_param, input_shape, output_shape)

    # --- small inference-style batch: f32 and bf16 compute paths ---
    x_small = jax.random.normal(k_x1, (8, input_shape), jnp.float32)
    mean_ref, log_std_ref = reference_forward(x_small, params)

    prep32 = prepare_policy_params(params, jnp.float32)
    mean32, log_std32 = policy_forward(x_small, prep32)
    jax.block_until_ready((mean32, log_std32))
    assert mean32.shape == (8, output_shape) and log_std32.shape == (8, output_shape)
    assert jnp.allclose(mean32, mean_ref, atol=1e-5, rtol=1e-5)
    assert jnp.allclose(log_std32, log_std_ref, atol=1e-5, rtol=1e-5)

    prep16 = prepare_policy_params(params, jnp.bfloat16)
    mean16, log_std16 = policy_forward(x_small, prep16)
    jax.block_until_ready((mean16, log_std16))
    assert jnp.allclose(mean16, mean_ref, atol=5e-2, rtol=5e-2)
    assert jnp.allclose(log_std16, log_std_ref, atol=5e-2, rtol=5e-2)

    # --- multi-tile grid path (non-aligned batch, small tile forces grid > 1) ---
    x_multi = jax.random.normal(k_x2, (40, input_shape), jnp.float32)
    mean_ref2, log_std_ref2 = reference_forward(x_multi, params)
    mean_m, log_std_m = policy_forward(x_multi, prep32, tile_rows=16)
    jax.block_until_ready((mean_m, log_std_m))
    assert mean_m.shape == (40, output_shape)
    assert jnp.allclose(mean_m, mean_ref2, atol=1e-5, rtol=1e-5)
    assert jnp.allclose(log_std_m, log_std_ref2, atol=1e-5, rtol=1e-5)

    print("KERNEL_OK")
</pallas_src>

<mosaic_0001>
module attributes {stable_mosaic.version = 11 : i64} {
  func.func @policy_kernel(%arg0: i32, %arg1: memref<8x16xf32, #tpu.memory_space<vmem>>, %arg2: memref<16x256xf32, #tpu.memory_space<vmem>>, %arg3: memref<1x256xf32, #tpu.memory_space<vmem>>, %arg4: memref<256x128xf32, #tpu.memory_space<vmem>>, %arg5: memref<1x128xf32, #tpu.memory_space<vmem>>, %arg6: memref<128x128xf32, #tpu.memory_space<vmem>>, %arg7: memref<1x128xf32, #tpu.memory_space<vmem>>, %arg8: memref<1x128xf32, #tpu.memory_space<vmem>>, %arg9: memref<8x128xf32, #tpu.memory_space<vmem>>) attributes {dimension_semantics = [#tpu.dimension_semantics<parallel>], iteration_bounds = array<i64: 1>, scalar_prefetch = 0 : i64, scratch_operands = 0 : i64, tpu.core_type = #tpu.core_type<tc>, window_params = [{transform_indices = @transform_0, window_bounds = array<i64: 8, 16>}, {pipeline_mode = #tpu.pipeline_mode<synchronous>, transform_indices = @transform_1, window_bounds = array<i64: 16, 256>}, {pipeline_mode = #tpu.pipeline_mode<synchronous>, transform_indices = @transform_2, window_bounds = array<i64: 1, 256>}, {pipeline_mode = #tpu.pipeline_mode<synchronous>, transform_indices = @transform_3, window_bounds = array<i64: 256, 128>}, {pipeline_mode = #tpu.pipeline_mode<synchronous>, transform_indices = @transform_4, window_bounds = array<i64: 1, 128>}, {pipeline_mode = #tpu.pipeline_mode<synchronous>, transform_indices = @transform_5, window_bounds = array<i64: 128, 128>}, {pipeline_mode = #tpu.pipeline_mode<synchronous>, transform_indices = @transform_6, window_bounds = array<i64: 1, 128>}, {pipeline_mode = #tpu.pipeline_mode<synchronous>, transform_indices = @transform_7, window_bounds = array<i64: 1, 128>}, {transform_indices = @transform_8, window_bounds = array<i64: 8, 128>}]} {
    %c0 = arith.constant 0 : index
    %c0_0 = arith.constant 0 : index
    %0 = vector.load %arg1[%c0, %c0_0] : memref<8x16xf32, #tpu.memory_space<vmem>>, vector<8x16xf32>
    %c0_1 = arith.constant 0 : index
    %c0_2 = arith.constant 0 : index
    %1 = vector.load %arg2[%c0_1, %c0_2] : memref<16x256xf32, #tpu.memory_space<vmem>>, vector<16x256xf32>
    %cst = arith.constant dense<0.000000e+00> : vector<8x256xf32>
    %2 = tpu.matmul %0, %1, %cst {dimension_numbers = #tpu.dot_dimension_numbers<[1], [0], [0], [1], [0, 0, 1, 1], [], []>} : vector<8x16xf32>, vector<16x256xf32>, vector<8x256xf32> -> vector<8x256xf32>
    %c0_3 = arith.constant 0 : index
    %c0_4 = arith.constant 0 : index
    %3 = vector.load %arg3[%c0_3, %c0_4] : memref<1x256xf32, #tpu.memory_space<vmem>>, vector<1x256xf32>
    %4 = vector.broadcast %3 : vector<1x256xf32> to vector<8x256xf32>
    %5 = arith.addf %2, %4 : vector<8x256xf32>
    %cst_5 = arith.constant 0.000000e+00 : f32
    %6 = vector.broadcast %cst_5 : f32 to vector<8x256xf32>
    %7 = arith.maximumf %5, %6 : vector<8x256xf32>
    %c0_6 = arith.constant 0 : index
    %c0_7 = arith.constant 0 : index
    %8 = vector.load %arg4[%c0_6, %c0_7] : memref<256x128xf32, #tpu.memory_space<vmem>>, vector<256x128xf32>
    %cst_8 = arith.constant dense<0.000000e+00> : vector<8x128xf32>
    %9 = tpu.matmul %7, %8, %cst_8 {dimension_numbers = #tpu.dot_dimension_numbers<[1], [0], [0], [1], [0, 0, 1, 1], [], []>} : vector<8x256xf32>, vector<256x128xf32>, vector<8x128xf32> -> vector<8x128xf32>
    %c0_9 = arith.constant 0 : index
    %c0_10 = arith.constant 0 : index
    %10 = vector.load %arg5[%c0_9, %c0_10] : memref<1x128xf32, #tpu.memory_space<vmem>>, vector<1x128xf32>
    %11 = vector.broadcast %10 : vector<1x128xf32> to vector<8x128xf32>
    %12 = arith.addf %9, %11 : vector<8x128xf32>
    %cst_11 = arith.constant 0.000000e+00 : f32
    %13 = vector.broadcast %cst_11 : f32 to vector<8x128xf32>
    %14 = arith.maximumf %12, %13 : vector<8x128xf32>
    %c0_12 = arith.constant 0 : index
    %c0_13 = arith.constant 0 : index
    %15 = vector.load %arg6[%c0_12, %c0_13] : memref<128x128xf32, #tpu.memory_space<vmem>>, vector<128x128xf32>
    %cst_14 = arith.constant dense<0.000000e+00> : vector<8x128xf32>
    %16 = tpu.matmul %14, %15, %cst_14 {dimension_numbers = #tpu.dot_dimension_numbers<[1], [0], [0], [1], [0, 0, 1, 1], [], []>} : vector<8x128xf32>, vector<128x128xf32>, vector<8x128xf32> -> vector<8x128xf32>
    %c0_15 = arith.constant 0 : index
    %c0_16 = arith.constant 0 : index
    %17 = vector.load %arg7[%c0_15, %c0_16] : memref<1x128xf32, #tpu.memory_space<vmem>>, vector<1x128xf32>
    %18 = vector.broadcast %17 : vector<1x128xf32> to vector<8x128xf32>
    %19 = arith.addf %16, %18 : vector<8x128xf32>
    %20 = math.tanh %19 : vector<8x128xf32>
    %cst_17 = arith.constant 3.500000e+00 : f32
    %21 = vector.broadcast %cst_17 : f32 to vector<8x128xf32>
    %22 = arith.mulf %20, %21 : vector<8x128xf32>
    %cst_18 = arith.constant -1.500000e+00 : f32
    %23 = vector.broadcast %cst_18 : f32 to vector<8x128xf32>
    %24 = arith.addf %22, %23 : vector<8x128xf32>
    %c0_19 = arith.constant 0 : index
    %c0_20 = arith.constant 0 : index
    %25 = vector.load %arg8[%c0_19, %c0_20] : memref<1x128xf32, #tpu.memory_space<vmem>>, vector<1x128xf32>
    %cst_21 = arith.constant 0.000000e+00 : f32
    %26 = vector.broadcast %cst_21 : f32 to vector<1x128xf32>
    %27 = arith.cmpf ogt, %25, %26 : vector<1x128xf32>
    %28 = vector.shape_cast %27 : vector<1x128xi1> to vector<1x128xi1>
    %29 = vector.broadcast %28 : vector<1x128xi1> to vector<8x128xi1>
    %30 = arith.select %29, %19, %24 : vector<8x128xi1>, vector<8x128xf32>
    %c0_22 = arith.constant 0 : index
    %c0_23 = arith.constant 0 : index
    %31 = vector.load %arg9[%c0_22, %c0_23] : memref<8x128xf32, #tpu.memory_space<vmem>>, vector<8x128xf32>
    tpu.vector_store %arg9[%c0_22, %c0_23], %30 {strides = array<i32>} : memref<8x128xf32, #tpu.memory_space<vmem>>, vector<8x128xf32>,
    return
  }
  func.func @transform_0(%arg0: i32) -> (i32, i32) {
    %c0_i32 = arith.constant 0 : i32
    %c0_i32_0 = arith.constant 0 : i32
    return %arg0, %c0_i32 : i32, i32
  }
  func.func @transform_1(%arg0: i32) -> (i32, i32) {
    %c0_i32 = arith.constant 0 : i32
    %c0_i32_0 = arith.constant 0 : i32
    %c0_i32_1 = arith.constant 0 : i32
    return %c0_i32, %c0_i32_0 : i32, i32
  }
  func.func @transform_2(%arg0: i32) -> (i32, i32) {
    %c0_i32 = arith.constant 0 : i32
    %c0_i32_0 = arith.constant 0 : i32
    %c0_i32_1 = arith.constant 0 : i32
    return %c0_i32, %c0_i32_0 : i32, i32
  }
  func.func @transform_3(%arg0: i32) -> (i32, i32) {
    %c0_i32 = arith.constant 0 : i32
    %c0_i32_0 = arith.constant 0 : i32
    %c0_i32_1 = arith.constant 0 : i32
    return %c0_i32, %c0_i32_0 : i32, i32
  }
  func.func @transform_4(%arg0: i32) -> (i32, i32) {
    %c0_i32 = arith.constant 0 : i32
    %c0_i32_0 = arith.constant 0 : i32
    %c0_i32_1 = arith.constant 0 : i32
    return %c0_i32, %c0_i32_0 : i32, i32
  }
  func.func @transform_5(%arg0: i32) -> (i32, i32) {
    %c0_i32 = arith.constant 0 : i32
    %c0_i32_0 = arith.constant 0 : i32
    %c0_i32_1 = arith.constant 0 : i32
    return %c0_i32, %c0_i32_0 : i32, i32
  }
  func.func @transform_6(%arg0: i32) -> (i32, i32) {
    %c0_i32 = arith.constant 0 : i32
    %c0_i32_0 = arith.constant 0 : i32
    %c0_i32_1 = arith.constant 0 : i32
    return %c0_i32, %c0_i32_0 : i32, i32
  }
  func.func @transform_7(%arg0: i32) -> (i32, i32) {
    %c0_i32 = arith.constant 0 : i32
    %c0_i32_0 = arith.constant 0 : i32
    %c0_i32_1 = arith.constant 0 : i32
    return %c0_i32, %c0_i32_0 : i32, i32
  }
  func.func @transform_8(%arg0: i32) -> (i32, i32) {
    %c0_i32 = arith.constant 0 : i32
    %c0_i32_0 = arith.constant 0 : i32
    return %arg0, %c0_i32 : i32, i32
  }
}

</mosaic_0001>

<bundles_post_ra>
// kernel: tpu_custom_call.1
= control target key start
LH: loop header
LB: loop body
LE: loop exit
PB: predicated region body
PF: predicated region fallthrough
CT: control target
= control target key end

     0   :  { %13 = vsyncpa [#allocation3], 0  ;;  %s561_s0 = inlined_call_operand.hbm [shape: f32[8,16], index: 0, kind: input, shape index: {}]   ;;  %s562_s1 = inlined_call_operand.hbm [shape: f32[16,256], index: 1, kind: input, shape index: {}]   ;;  %s563_s2 = inlined_call_operand.hbm [shape: f32[1,256], index: 2, kind: input, shape index: {}]   ;;  %s564_s3 = inlined_call_operand.hbm [shape: f32[256,128], index: 3, kind: input, shape index: {}]   ;;  %s565_s4 = inlined_call_operand.vmem [shape: f32[1,128], index: 4, kind: input, shape index: {}]   ;;  %s566_s5 = inlined_call_operand.hbm [shape: f32[128,128], index: 5, kind: input, shape index: {}]   ;;  %s567_s6 = inlined_call_operand.vmem [shape: f32[1,128], index: 6, kind: input, shape index: {}]   ;;  %s568_s7 = inlined_call_operand.vmem [shape: f32[1,128], index: 7, kind: input, shape index: {}]   ;;  %s569_s8 = inlined_call_operand.hbm [shape: f32[8,128], index: 8, kind: output, shape index: {}]  }
   0x1   :  { %14 = vsyncpa [#allocation6], 0 }
   0x2   :  { %15 = vsyncpa [#allocation9], 0  ;;  %s32_s29 = sshll.u32 %s562_s1, 4  ;;  %s33_s29 = int_to_ptr.hbm [resolvable:$true] %s32_s29 }
   0x3   :  { %16 = vsyncpa [#allocation4], 0  ;;  %s476_s30 = smov [#allocation5]   ;;  %s56_s12 = sshll.u32 %s564_s3, 4  ;;  %s57_s12 = int_to_ptr.hbm [resolvable:$true] %s56_s12 }
   0x4   :  { %s34_s9 = sshll.u32 %s476_s30, 4  ;;  %s477_s13 = smov 256   ;;  %s35_s9 = int_to_ptr.vmem [resolvable:$true] %s34_s9 }
   0x5   :  { %s478_s14 = smov 16   ;;  %s479_s15 = smov [#allocation8]  }
   0x6   :  { %40 = dma.hbm_to_vmem [thread:$0]  %s33_s29, 512, %s35_s9, [#allocation6], %s477_s13, %s477_s13, %s478_s14  }
   0x7   :  { %s58_s16 = sshll.u32 %s479_s15, 4  ;;  %s480_s17 = smov 128   ;;  %s59_s16 = int_to_ptr.vmem [resolvable:$true] %s58_s16 }
   0x8   :  { %s481_s18 = smov 8   ;;  %s22_s20 = sshll.u32 %s561_s0, 4  ;;  %s23_s20 = int_to_ptr.hbm [resolvable:$true] %s22_s20 }
   0x9   :  { %64 = dma.hbm_to_vmem [thread:$0]  %s57_s12, 4096, %s59_s16, [#allocation9], %s480_s17, %s480_s17, %s481_s18  }
   0xa   :  { %s482_s21 = smov [#allocation2]   ;;  %s46_s24 = sshll.u32 %s563_s2, 4  ;;  %s47_s24 = int_to_ptr.hbm [resolvable:$true] %s46_s24 }
   0xb   :  { %s24_s22 = sshll.u32 %s482_s21, 4  ;;  %s483_s25 = smov [#allocation7]   ;;  %s25_s22 = int_to_ptr.vmem [resolvable:$true] %s24_s22 }
   0xc   :  { %27 = dma.hbm_to_vmem [thread:$0]  %s23_s20, 128, %s25_s22, [#allocation3]  }
   0xd   :  { %s48_s26 = sshll.u32 %s483_s25, 4  ;;  %s71_s29 = sshll.u32 %s566_s5, 4  ;;  %s49_s26 = int_to_ptr.vmem [resolvable:$true] %s48_s26  ;;  %s72_s29 = int_to_ptr.hbm [resolvable:$true] %s71_s29 }
   0xe   :  { %51 = dma.hbm_to_vmem [thread:$0]  %s47_s24, 32, %s49_s26, [#allocation6]  }
   0xf   :  { %s484_s0 = smov [#allocation10]  }
  0x10   :  { %s73_s30 = sshll.u32 %s484_s0, 4  ;;  %s74_s30 = int_to_ptr.vmem [resolvable:$true] %s73_s30 }
  0x11   :  { %79 = dma.hbm_to_vmem [thread:$0]  %s72_s29, 2048, %s74_s30, [#allocation9], %s480_s17, %s480_s17, %s481_s18  }
  0x12   :  { %468 = dma.done.wait [#allocation3], 128  }
  0x13   :  { %469 = vsyncadd [#allocation3], 4294967168 }
  0x14   :  { %470 = dma.done.wait [#allocation6], 544  }
  0x15   :  { %471 = vsyncadd [#allocation6], 4294966752 }
  0x16   :  { %472 = dma.done.wait [#allocation9], 6144  }
  0x17   :  { %473 = vsyncadd [#allocation9], 4294961152  ;;  %v107_v0 = vld [vmem:[#allocation5 + $0x10] sm:$0xff]  ;;  %v105_v1 = vld [vmem:[#allocation5] sm:$0xff]  ;;  %vm115_vm0 = vcmask 130048   ;;  %s295_s16 = sshll.u32 %s569_s8, 4  ;;  %s296_s16 = int_to_ptr.hbm [resolvable:$true] %s295_s16 }
  0x18   :  { %133 = vmatpush.msra.mxu1 %v107_v0  ;;  %v104_v2 = vld [vmem:[#allocation2] sm:$0xff]  ;;  %v174_v6 = vld [vmem:[#allocation8 + $0x68] sm:$0xff]  ;;  %v173_v10 = vld [vmem:[#allocation8 + $0x60] sm:$0xff] }
  0x19   :  { %v176_v3 = vld [vmem:[#allocation8 + $0x78] sm:$0xff]  ;;  %v175_v5 = vld [vmem:[#allocation8 + $0x70] sm:$0xff]  ;;  %v106_v8 = vld [vmem:[#allocation5 + $0x8] sm:$0xff] }
  0x1a   :  { %v108_v4 = vld [vmem:[#allocation5 + $0x18] sm:$0xff]  ;;  %197 = vmatpush.msra.mxu2 %v176_v3  ;;  %134 = vmatpush.msra.mxu1 %v105_v1  ;;  %v190_v11 = vld [vmem:[#allocation8 + $0xe8] sm:$0xff]  ;;  %v189_v13 = vld [vmem:[#allocation8 + $0xe0] sm:$0xff] }
  0x1b   :  { %v192_v7 = vld [vmem:[#allocation8 + $0xf8] sm:$0xff]  ;;  %307 = vmatmul.msk.f32.vlgmr.msra.gmra.mxu1 %vm115_vm0, %v104_v2  ;;  %v191_v9 = vld [vmem:[#allocation8 + $0xf0] sm:$0xff]  ;;  %v170_v16 = vld [vmem:[#allocation8 + $0x48] sm:$0xff] }
  0x1c   :  { %198 = vmatpush.msra.mxu2 %v175_v5  ;;  %153 = vmatpush.msrb.mxu1 %v108_v4  ;;  %v172_v12 = vld [vmem:[#allocation8 + $0x58] sm:$0xff]  ;;  %v171_v14 = vld [vmem:[#allocation8 + $0x50] sm:$0xff]  ;;  %v169_v18 = vld [vmem:[#allocation8 + $0x40] sm:$0xff] }
  0x1d   :  { %217 = vmatpush.msra.mxu3 %v192_v7  ;;  %v188_v15 = vld [vmem:[#allocation8 + $0xd8] sm:$0xff]  ;;  %v187_v17 = vld [vmem:[#allocation8 + $0xd0] sm:$0xff]  ;;  %v186_v19 = vld [vmem:[#allocation8 + $0xc8] sm:$0xff] }
  0x1e   :  { %199 = vmatpush.msra.mxu2 %v174_v6  ;;  %154 = vmatpush.msrb.mxu1 %v106_v8  ;;  %v168_v20 = vld [vmem:[#allocation8 + $0x38] sm:$0xff]  ;;  %v185_v21 = vld [vmem:[#allocation8 + $0xc0] sm:$0xff]  ;;  %v167_v22 = vld [vmem:[#allocation8 + $0x30] sm:$0xff]  ;;  %v485_v8 = vmov 0  }
  0x1f   :  { %218 = vmatpush.msra.mxu3 %v191_v9  ;;  %v184_v23 = vld [vmem:[#allocation8 + $0xb8] sm:$0xff]  ;;  %v166_v24 = vld [vmem:[#allocation8 + $0x28] sm:$0xff]  ;;  %v165_v25 = vld [vmem:[#allocation8 + $0x20] sm:$0xff] }
  0x20   :  { %200 = vmatpush.msra.mxu2 %v173_v10  ;;  %v164_v26 = vld [vmem:[#allocation8 + $0x18] sm:$0xff]  ;;  %v163_v27 = vld [vmem:[#allocation8 + $0x10] sm:$0xff]  ;;  %v162_v29 = vld [vmem:[#allocation8 + $0x8] sm:$0xff] }
  0x21   :  { %219 = vmatpush.msra.mxu3 %v190_v11  ;;  %v183_v28 = vld [vmem:[#allocation8 + $0xb0] sm:$0xff]  ;;  %v182_v30 = vld [vmem:[#allocation8 + $0xa8] sm:$0xff]  ;;  %v161_v31 = vld [vmem:[#allocation8] sm:$0xff] }
  0x22   :  { %201 = vmatpush.msra.mxu2 %v172_v12  ;;  %v181_v32 = vld [vmem:[#allocation8 + $0xa0] sm:$0xff]  ;;  %v180_v33 = vld [vmem:[#allocation8 + $0x98] sm:$0xff]  ;;  %v179_v34 = vld [vmem:[#allocation8 + $0x90] sm:$0xff] }
  0x23   :  { %220 = vmatpush.msra.mxu3 %v189_v13  ;;  %308 = vmatmul.msk.f32.vlgmr.msrb.gmra.mxu1 %vm115_vm0, %v104_v2  ;;  %v178_v35 = vld [vmem:[#allocation8 + $0x88] sm:$0xff]  ;;  %v177_v36 = vld [vmem:[#allocation8 + $0x80] sm:$0xff]  ;;  %v253_v37 = vld [vmem:[#allocation10 + $0x78] sm:$0xff] }
  0x24   :  { %202 = vmatpush.msra.mxu2 %v171_v14  ;;  %v252_v38 = vld [vmem:[#allocation10 + $0x70] sm:$0xff]  ;;  %258 = vmatpush.msra.mxu0 %v253_v37  ;;  %v251_v39 = vld [vmem:[#allocation10 + $0x68] sm:$0xff]  ;;  %v250_v40 = vld [vmem:[#allocation10 + $0x60] sm:$0xff] }
  0x25   :  { %221 = vmatpush.msra.mxu3 %v188_v15  ;;  %v249_v41 = vld [vmem:[#allocation10 + $0x58] sm:$0xff]  ;;  %v248_v42 = vld [vmem:[#allocation10 + $0x50] sm:$0xff]  ;;  %v247_v43 = vld [vmem:[#allocation10 + $0x48] sm:$0xff] }
  0x26   :  { %203 = vmatpush.msra.mxu2 %v170_v16  ;;  %259 = vmatpush.msra.mxu0 %v252_v38  ;;  %v246_v44 = vld [vmem:[#allocation10 + $0x40] sm:$0xff]  ;;  %v109_v45 = vld [vmem:[#allocation7] sm:$0x3]  ;;  %v244_v55 = vld [vmem:[#allocation10 + $0x30] sm:$0xff] }
  0x27   :  { %222 = vmatpush.msra.mxu3 %v187_v17  ;;  %v245_v46 = vld [vmem:[#allocation10 + $0x38] sm:$0xff]  ;;  %v111_v47 = vperm.slane %v109_v45, 0  ;;  %v112_v51 = vperm.slane %v109_v45, 1  ;;  %v243_v56 = vld [vmem:[#allocation10 + $0x28] sm:$0xff]  ;;  %v242_v57 = vld [vmem:[#allocation10 + $0x20] sm:$0xff] }
  0x28   :  { %204 = vmatpush.msra.mxu2 %v169_v18  ;;  %260 = vmatpush.msra.mxu0 %v251_v39  ;;  %v241_v58 = vld [vmem:[#allocation10 + $0x18] sm:$0xff]  ;;  %v240_v59 = vld [vmem:[#allocation10 + $0x10] sm:$0xff]  ;;  %v239_v60 = vld [vmem:[#allocation10 + $0x8] sm:$0xff] }
  0x29   :  { %223 = vmatpush.msra.mxu3 %v186_v19  ;;  %v238_v61 = vld [vmem:[#allocation10] sm:$0xff]  ;;  %v320_v62 = vld [vmem:[%s565_s4] ss:$0 sm:$0xff]  ;;  %s486_s4 = smov [#allocation11]  }
  0x2a   :  { %205 = vmatpush.msra.mxu2 %v168_v20  ;;  %261 = vmatpush.msra.mxu0 %v250_v40  ;;  %v321_v4 = vld [vmem:[%s567_s6] ss:$0 sm:$0xff]  ;;  %s293_s13 = sshll.u32 %s486_s4, 4  ;;  %s294_s13 = int_to_ptr.vmem [resolvable:$true] %s293_s13 }
  0x2b   :  { %224 = vmatpush.msra.mxu3 %v185_v21  ;;  %v281_v5 = vld [vmem:[%s568_s7] sm:$0x1] }
  0x2c   :  { %206 = vmatpush.msra.mxu2 %v167_v22  ;;  %262 = vmatpush.msra.mxu0 %v249_v41  ;;  %vm282_vm1 = vcmp.gt.f32.partialorder %v281_v5, 0.0 }
  0x2d   :  { %225 = vmatpush.msra.mxu3 %v184_v23  ;;  %v283_v9 = vsel %vm282_vm1, 1, %v485_v8 }
  0x2e   :  { %207 = vmatpush.msra.mxu2 %v166_v24  ;;  %263 = vmatpush.msra.mxu0 %v248_v42  ;;  %v284_v10 = vperm.slane %v283_v9, 0 }
  0x2f   :  { %226 = vmatpush.msra.mxu3 %v183_v28 }
  0x30   :  { %208 = vmatpush.msra.mxu2 %v165_v25  ;;  %264 = vmatpush.msra.mxu0 %v247_v43  ;;  %vm285_vm2 = vcmp.eq.s32.totalorder %v284_v10, 1 }
  0x31   :  { %227 = vmatpush.msra.mxu3 %v182_v30 }
  0x32   :  { %209 = vmatpush.msra.mxu2 %v164_v26  ;;  %265 = vmatpush.msra.mxu0 %v246_v44 }
  0x33   :  { %228 = vmatpush.msra.mxu3 %v181_v32 }
  0x34   :  { %210 = vmatpush.msra.mxu2 %v163_v27  ;;  %266 = vmatpush.msra.mxu0 %v245_v46 }
  0x35   :  { %229 = vmatpush.msra.mxu3 %v180_v33 }
  0x36   :  { %211 = vmatpush.msra.mxu2 %v162_v29  ;;  %267 = vmatpush.msra.mxu0 %v244_v55 }
  0x37   :  { %230 = vmatpush.msra.mxu3 %v179_v34 }
  0x38   :  { %212 = vmatpush.msra.mxu2 %v161_v31  ;;  %268 = vmatpush.msra.mxu0 %v243_v56 }
  0x39   :  { %231 = vmatpush.msra.mxu3 %v178_v35 }
  0x3a   :  { %269 = vmatpush.msra.mxu0 %v242_v57 }
  0x3b   :  { %232 = vmatpush.msra.mxu3 %v177_v36 }
  0x3c   :  { %270 = vmatpush.msra.mxu0 %v241_v58 }
  0x3e   :  { %271 = vmatpush.msra.mxu0 %v240_v59 }
  0x40   :  { %272 = vmatpush.msra.mxu0 %v239_v60 }
  0x42   :  { %273 = vmatpush.msra.mxu0 %v238_v61 }
  0x98   :  { %v136_v48 = vpop.f32.mrf.mxu1 }
  0x99   :  { %v137_v49 = vadd.f32 %v136_v48, %v111_v47 }
  0x9b   :  { %v159_v50 = vmax.f32 %v137_v49, 0.0 }
  0x9d   :  { %213 = vmatmul.f32.vlgmr.msra.gmra.mxu2 %v159_v50 }
  0xa0   :  { %v156_v52 = vpop.f32.mrf.mxu1 }
  0xa1   :  { %v157_v53 = vadd.f32 %v156_v52, %v112_v51 }
  0xa3   :  { %v160_v54 = vmax.f32 %v157_v53, 0.0 }
  0xa5   :  { %233 = vmatmul.f32.vlgmr.msra.gmra.mxu3 %v160_v54 }
 0x120   :  { %v214_v63 = vpop.f32.mrf.mxu2 }
 0x121   :  { %v215_v0 = vadd.f32 %v320_v62, %v214_v63 }
 0x128   :  { %v234_v1 = vpop.f32.mrf.mxu3 }
 0x129   :  { %v235_v2 = vadd.f32 %v234_v1, %v215_v0 }
 0x12b   :  { %v237_v3 = vmax.f32 %v235_v2, 0.0 }
 0x12d   :  { %274 = vmatmul.f32.vlgmr.msra.gmra.mxu0 %v237_v3 }
 0x1aa   :  { %v275_v6 = vpop.f32.mrf.mxu0 }
 0x1ab   :  { %v276_v7 = vadd.f32 %v321_v4, %v275_v6 }
 0x1ad   :  { %322 = vtanh.f32 %v276_v7 }
 0x1b3   :  { %v323_v11 = vpop.eup %322 }
 0x1b4   :  { %v279_v12 = vmul.f32 3.5, %v323_v11 }
 0x1b6   :  { %v280_v13 = vadd.f32 -1.5, %v279_v12 }
 0x1b8   :  { %v286_v14 = vsel %vm285_vm2, %v276_v7, %v280_v13 }
 0x1b9   :  { %287 = vst [vmem:[#allocation11] sm:$0xff] %v286_v14 }
 0x1ba   :  { %298 = dma.vmem_to_hbm [thread:$0]  %s294_s13, 128, %s296_s16, [#allocation4]  }
 0x1bb   :  { %474 = dma.done.wait [#allocation4], 128  }
 0x1bc   :  { %475 = vsyncadd [#allocation4], 4294967168 }
 0x1bd   :  { %303 = vsyncpa [#allocation3], 1 }
 0x1be   :  { %304 = vsyncpa [#allocation6], 1 }
 0x1bf   :  { %305 = vsyncpa [#allocation9], 1 }
 0x1c0   :  { %306 = vsyncpa [#allocation4], 1 }

</bundles_post_ra>
